<compile_context>
chip_gen: v7x
topology: tpu7x:2x2x1
jax: 0.10.0
libtpu: 0.0.40
codegen_flags: <defaults>
</compile_context>

<pallas_src>
import numpy as np
import jax
import jax.numpy as jnp
from jax.experimental import pallas as pl
from jax.experimental.pallas import tpu as pltpu


# ----------------------------------------------------------------------------
# Parameter / weight construction (mirrors binning_CRVD.__init__ + the weight
# assembly loop in forward()).  Pure glue — plain numpy.
# Returns both the dense (16, 64) matrix (for reference checks) and the
# compacted (16, 4) matrix used by the kernel: Wc[o, j] = dense[o, j*16 + o].
# ----------------------------------------------------------------------------
def make_binning_crvd_weights(bin_gb=None, bin_b=None, bin_r=None, bin_gr=None):
    tmp = np.ones((1, 4, 1, 1), dtype=np.float32) * (1.0 / 4.0)  # module init
    def _p(p):
        return tmp.copy() if p is None else np.asarray(p, np.float32).reshape(1, 4, 1, 1)
    bin_gb, bin_b, bin_r, bin_gr = _p(bin_gb), _p(bin_b), _p(bin_r), _p(bin_gr)

    n = 16
    dense = np.zeros((16, 64), dtype=np.float32)
    for i in range(4):
        for j in range(4):
            dense[i, j * n + i] = bin_gb[0, j, 0, 0]
            dense[4 + i, j * n + i + 4] = bin_b[0, j, 0, 0]
            dense[8 + i, j * n + i + 8] = bin_r[0, j, 0, 0]
            dense[12 + i, j * n + i + 12] = bin_gr[0, j, 0, 0]

    compact = np.zeros((16, 4), dtype=np.float32)
    for o in range(16):
        for j in range(4):
            compact[o, j] = dense[o, j * 16 + o]  # the single nonzero of that group
    return jnp.asarray(dense), jnp.asarray(compact)


# ----------------------------------------------------------------------------
# Pallas kernel: 4-term VPU weighted sum (no MXU).
#   w_ref: (16, 4)        compacted weight, constant block index -> resident
#   x_ref: (1, 64, ts)    one image's channels x spatial tile
#   o_ref: (1, 16, ts)    output channels x spatial tile (lane-dense store)
# Channel slices start at 0/16/32/48 -> sublane-aligned, full-lane loads.
# ----------------------------------------------------------------------------
def _binning_kernel(w_ref, x_ref, o_ref):
    w = w_ref[...]                                    # (16, 4)
    acc = w[:, 0:1] * x_ref[0, 0:16, :]
    acc = acc + w[:, 1:2] * x_ref[0, 16:32, :]
    acc = acc + w[:, 2:3] * x_ref[0, 32:48, :]
    acc = acc + w[:, 3:4] * x_ref[0, 48:64, :]
    o_ref[0] = acc


def _round_up(x, m):
    return ((x + m - 1) // m) * m


def binning_crvd_forward(x_nchw, bin_compact):
    """x_nchw: (N, 64, H, W) float32.  bin_compact: (16, 4).  -> (N, 16, H, W)."""
    N, C, H, W = x_nchw.shape
    assert C == 64, "binning_CRVD expects 64 input channels"
    C_out = bin_compact.shape[0]  # 16
    HW = H * W

    # Keep the lane (last) dim 128-dense: pad the spatial extent to a multiple
    # of 128 so every store is an unmasked full-lane vst (biggest single lever).
    HW_pad = _round_up(HW, 128)

    # Free view of the spatial dims, then (cheap) pad if HW isn't 128-aligned.
    x3 = x_nchw.reshape(N, C, HW)
    if HW_pad != HW:
        x3 = jnp.pad(x3, ((0, 0), (0, 0), (0, HW_pad - HW)))

    # Spatial tile: large (amortizes ~0.35 us/step overhead) but VMEM-safe on
    # every generation: ts=32768 f32 -> x-block 8 MiB, out-block 2 MiB,
    # ~20 MiB with default double buffering (< 32 MiB scoped default,
    # < v7x's 64 MiB physical VMEM).
    MAX_TS = 32768
    ts = HW_pad if HW_pad <= MAX_TS else MAX_TS
    num_s = pl.cdiv(HW_pad, ts)

    # v7x megacore: guarantee >= 2 parallel grid steps so both TensorCores
    # get work (no-op on v5e/v6e which have a single TC).
    if N * num_s < 2 and HW_pad >= 256:
        ts = _round_up(pl.cdiv(HW_pad, 2), 128)
        num_s = pl.cdiv(HW_pad, ts)

    grid = (N, num_s)

    # Advisory cost hint for XLA's scheduler (bandwidth-bound custom call).
    cost = pl.CostEstimate(
        flops=7 * N * C_out * HW_pad,                       # 4 mul + 3 add / elem
        transcendentals=0,
        bytes_accessed=(C + C_out) * N * HW_pad * 4 + C_out * 4 * 4,
    )

    out3 = pl.pallas_call(
        _binning_kernel,
        out_shape=jax.ShapeDtypeStruct((N, C_out, HW_pad), jnp.float32),
        grid_spec=pltpu.PrefetchScalarGridSpec(
            num_scalar_prefetch=0,
            grid=grid,
            in_specs=[
                # Compacted weight: constant block index -> loaded once, resident.
                pl.BlockSpec((C_out, 4), lambda n, s: (0, 0)),
                # Activations: one image, all 64 channels, one spatial tile.
                pl.BlockSpec((1, C, ts), lambda n, s: (n, 0, s)),
            ],
            out_specs=pl.BlockSpec((1, C_out, ts), lambda n, s: (n, 0, s)),
        ),
        compiler_params=pltpu.CompilerParams(
            # No reduction axis; both grid axes independent -> megacore-shardable.
            dimension_semantics=("parallel", "parallel"),
        ),
        cost_estimate=cost,
    )(bin_compact, x3)

    # Drop the spatial padding and restore (H, W); channel order is already NCHW.
    return out3[:, :, :HW].reshape(N, C_out, H, W)


if __name__ == "__main__":
    kp, kx1, kx2 = jax.random.split(jax.random.PRNGKey(0), 3)

    # Use distinct (deterministic) parameter values so the sparse-weight
    # mapping is genuinely exercised (module default init is uniform 1/4).
    params = np.asarray(jax.random.uniform(kp, (4, 4), dtype=jnp.float32))
    bin_dense, bin_compact = make_binning_crvd_weights(
        params[0], params[1], params[2], params[3]
    )

    # Case 1: small NCHW input (HW = 64 < 128 -> exercises the lane-pad path).
    x1 = jax.random.normal(kx1, (2, 64, 8, 8), dtype=jnp.float32)
    out1 = jax.block_until_ready(binning_crvd_forward(x1, bin_compact))
    ref1 = jnp.einsum("oc,nchw->nohw", bin_dense, x1)
    assert out1.shape == (2, 16, 8, 8)
    np.testing.assert_allclose(np.asarray(out1), np.asarray(ref1),
                               rtol=1e-5, atol=1e-5)

    # Case 2: N=1, 128-aligned HW -> exercises the >=2-grid-step (megacore) split.
    x2 = jax.random.normal(kx2, (1, 64, 16, 24), dtype=jnp.float32)
    out2 = jax.block_until_ready(binning_crvd_forward(x2, bin_compact))
    ref2 = jnp.einsum("oc,nchw->nohw", bin_dense, x2)
    assert out2.shape == (1, 16, 16, 24)
    np.testing.assert_allclose(np.asarray(out2), np.asarray(ref2),
                               rtol=1e-5, atol=1e-5)

    print("KERNEL_OK")
</pallas_src>

<mosaic_0001>
module attributes {stable_mosaic.version = 11 : i64} {
  func.func @_binning_kernel(%arg0: i32, %arg1: i32, %arg2: memref<16x4xf32, #tpu.memory_space<vmem>>, %arg3: memref<1x64x128xf32, #tpu.memory_space<vmem>>, %arg4: memref<1x16x128xf32, #tpu.memory_space<vmem>>) attributes {dimension_semantics = [#tpu.dimension_semantics<parallel>, #tpu.dimension_semantics<parallel>], iteration_bounds = array<i64: 2, 1>, scalar_prefetch = 0 : i64, scratch_operands = 0 : i64, tpu.core_type = #tpu.core_type<tc>, window_params = [{pipeline_mode = #tpu.pipeline_mode<synchronous>, transform_indices = @transform_0, window_bounds = array<i64: 16, 4>}, {transform_indices = @transform_1, window_bounds = array<i64: 1, 64, 128>}, {transform_indices = @transform_2, window_bounds = array<i64: 1, 16, 128>}]} {
    %c0 = arith.constant 0 : index
    %c0_0 = arith.constant 0 : index
    %0 = vector.load %arg2[%c0, %c0_0] : memref<16x4xf32, #tpu.memory_space<vmem>>, vector<16x4xf32>
    %1 = vector.extract_strided_slice %0 {offsets = [0, 0], sizes = [16, 1], strides = [1, 1]} : vector<16x4xf32> to vector<16x1xf32>
    %c0_1 = arith.constant 0 : index
    %c0_2 = arith.constant 0 : index
    %c0_3 = arith.constant 0 : index
    %2 = vector.load %arg3[%c0_1, %c0_2, %c0_3] : memref<1x64x128xf32, #tpu.memory_space<vmem>>, vector<1x16x128xf32>
    %3 = vector.shape_cast %2 : vector<1x16x128xf32> to vector<16x128xf32>
    %4 = vector.broadcast %1 : vector<16x1xf32> to vector<16x128xf32>
    %5 = arith.mulf %4, %3 : vector<16x128xf32>
    %6 = vector.extract_strided_slice %0 {offsets = [0, 1], sizes = [16, 1], strides = [1, 1]} : vector<16x4xf32> to vector<16x1xf32>
    %c0_4 = arith.constant 0 : index
    %c16 = arith.constant 16 : index
    %c0_5 = arith.constant 0 : index
    %7 = vector.load %arg3[%c0_4, %c16, %c0_5] : memref<1x64x128xf32, #tpu.memory_space<vmem>>, vector<1x16x128xf32>
    %8 = vector.shape_cast %7 : vector<1x16x128xf32> to vector<16x128xf32>
    %9 = vector.broadcast %6 : vector<16x1xf32> to vector<16x128xf32>
    %10 = arith.mulf %9, %8 : vector<16x128xf32>
    %11 = arith.addf %5, %10 : vector<16x128xf32>
    %12 = vector.extract_strided_slice %0 {offsets = [0, 2], sizes = [16, 1], strides = [1, 1]} : vector<16x4xf32> to vector<16x1xf32>
    %c0_6 = arith.constant 0 : index
    %c32 = arith.constant 32 : index
    %c0_7 = arith.constant 0 : index
    %13 = vector.load %arg3[%c0_6, %c32, %c0_7] : memref<1x64x128xf32, #tpu.memory_space<vmem>>, vector<1x16x128xf32>
    %14 = vector.shape_cast %13 : vector<1x16x128xf32> to vector<16x128xf32>
    %15 = vector.broadcast %12 : vector<16x1xf32> to vector<16x128xf32>
    %16 = arith.mulf %15, %14 : vector<16x128xf32>
    %17 = arith.addf %11, %16 : vector<16x128xf32>
    %18 = vector.extract_strided_slice %0 {offsets = [0, 3], sizes = [16, 1], strides = [1, 1]} : vector<16x4xf32> to vector<16x1xf32>
    %c0_8 = arith.constant 0 : index
    %c48 = arith.constant 48 : index
    %c0_9 = arith.constant 0 : index
    %19 = vector.load %arg3[%c0_8, %c48, %c0_9] : memref<1x64x128xf32, #tpu.memory_space<vmem>>, vector<1x16x128xf32>
    %20 = vector.shape_cast %19 : vector<1x16x128xf32> to vector<16x128xf32>
    %21 = vector.broadcast %18 : vector<16x1xf32> to vector<16x128xf32>
    %22 = arith.mulf %21, %20 : vector<16x128xf32>
    %23 = arith.addf %17, %22 : vector<16x128xf32>
    %c0_10 = arith.constant 0 : index
    %c0_11 = arith.constant 0 : index
    %c0_12 = arith.constant 0 : index
    %24 = vector.load %arg4[%c0_10, %c0_11, %c0_12] : memref<1x16x128xf32, #tpu.memory_space<vmem>>, vector<1x16x128xf32>
    %25 = vector.shape_cast %24 : vector<1x16x128xf32> to vector<16x128xf32>
    %26 = vector.shape_cast %23 : vector<16x128xf32> to vector<1x16x128xf32>
    tpu.vector_store %arg4[%c0_10, %c0_11, %c0_12], %26 {strides = array<i32>} : memref<1x16x128xf32, #tpu.memory_space<vmem>>, vector<1x16x128xf32>,
    return
  }
  func.func @transform_0(%arg0: i32, %arg1: i32) -> (i32, i32) {
    %c0_i32 = arith.constant 0 : i32
    %c0_i32_0 = arith.constant 0 : i32
    %c0_i32_1 = arith.constant 0 : i32
    return %c0_i32, %c0_i32_0 : i32, i32
  }
  func.func @transform_1(%arg0: i32, %arg1: i32) -> (i32, i32, i32) {
    %c0_i32 = arith.constant 0 : i32
    %c0_i32_0 = arith.constant 0 : i32
    return %arg0, %c0_i32, %arg1 : i32, i32, i32
  }
  func.func @transform_2(%arg0: i32, %arg1: i32) -> (i32, i32, i32) {
    %c0_i32 = arith.constant 0 : i32
    %c0_i32_0 = arith.constant 0 : i32
    return %arg0, %c0_i32, %arg1 : i32, i32, i32
  }
}

</mosaic_0001>

<bundles_post_ra>
// kernel: tpu_custom_call.1
= control target key start
LH: loop header
LB: loop body
LE: loop exit
PB: predicated region body
PF: predicated region fallthrough
CT: control target
= control target key end

     0   :  { %7 = vsyncpa [#allocation3], 0  ;;  %s763_s0 = inlined_call_operand.vmem [shape: f32[16,4], index: 0, kind: input, shape index: {}]   ;;  %s764_s1 = inlined_call_operand.hbm [shape: f32[2,64,128], index: 1, kind: input, shape index: {}]   ;;  %s765_s2 = inlined_call_operand.hbm [shape: f32[2,16,128], index: 2, kind: output, shape index: {}]  }
   0x1   :  { %9 = vsyncpa [#allocation3 + $0x1], 0 }
   0x2   :  { %10 = vsyncpa [#allocation4], 0 }
   0x3   :  { %12 = vsyncpa [#allocation4 + $0x1], 0  ;;  %s571_s9 = smov 0   ;;  %s573_s10 = smov 0  }
   0x4   :  { %s575_s11 = smov 0   ;;  %s577_s12 = smov 0  }
   0x5   :  { %s579_s13 = smov 0   ;;  %s581_s14 = smov 0  }
   0x6 LB: > { %s339_s15 = sadd.s32 4294967295, %s544_s14   ;;  %s340_s16 = sadd.s32 4294967294, %s544_s14   ;;  %s544_s14 = sphi %s581_s14, %s18_s14   ;;  %s540_s13 = sphi %s579_s13, %s780_s13   ;;  %s536_s12 = sphi %s577_s12, %s779_s12   ;;  %s532_s11 = sphi %s575_s11, %s778_s11   ;;  %s528_s10 = sphi %s573_s10, %s777_s10   ;;  %s524_s9 = sphi %s571_s9, %s776_s9  }
   0x7   : > { %s30_s17 = sadd.s32 1, %s540_s13  ;;  %s60_s18 = sadd.s32 1, %s532_s11 }
   0x8   : > { %p32_p0 = scmp.ge.s32.totalorder %s30_s17, 2  ;;  %p67_p1 = scmp.ne.s32.totalorder %s532_s11, %s528_s10 }
   0x9   : > { %p68_p2 = scmp.eq.s32.totalorder %s544_s14, 0  ;;  %p73_p3 = scmp.ne.s32.totalorder %s528_s10, %s524_s9 }
   0xa   : > { %s782_s17 = smov (%p32_p0, %s30_s17), 0  ;;  %p74_p5 = scmp.eq.s32.totalorder %s339_s15, 0 }
   0xb   : > { %p612_p4 = por %p68_p2, %p67_p1  ;;  %s55_s20 = ssub.s32 %s540_s13, %s782_s17 }
   0xc   : > { %p99_p6 = scmp.eq.s32.totalorder %s339_s15, 1  ;;  %p58_p7 = scmp.eq.s32.totalorder %s55_s20, 0 }
   0xd   : > { %p618_p8 = por %p74_p5, %p73_p3  ;;  %p105_p10 = scmp.eq.s32.totalorder %s340_s16, 1 }
   0xe   : > { %p622_p9 = por %p99_p6, %p67_p1  ;;  %p368_p13 = scmp.lt.s32.totalorder %s544_s14, 2 }
   0xf   : > { %s627_s23 = scalar_select %p58_p7, %s532_s11, %s60_s18  }
  0x10   : > { %s769_s22 = scalar_select %p622_p9, 1, 0 }
  0x11   : > { %p629_p11 = por %p105_p10, %p73_p3  ;;  %s128_s25 = sand.u32 1, %s532_s11  }
  0x12   : > { %s343_s26 = sshll.u32 %s128_s25, 6  ;;  %s354_s27 = sshll.u32 %s540_s13, 10 }
  0x13   : > { %s770_s24 = scalar_select %p629_p11, 1, 0 }
  0x14   : > { %s640_s30 = scalar_lea.hbm %s764_s1, %s354_s27  ;;  %s132_s3 = scalar_lea.vmem [#allocation2], %s343_s26 }
  0x15   : > { %s140_s4 = sshll.u32 %s132_s3, 4  ;;  %p646_p0 = pnand %p368_p13, %p612_p4  ;;  %s642_s4 = int_to_ptr.vmem [resolvable:$true] %s140_s4 }
  0x16   : > { %s651_s6 = scalar_lea.sflag [#allocation3], %s128_s25  ;;  %s432_s7 = scalar_lea.hbm %s640_s30, 1024 }
  0x17   : > { %p433_p2 = scmp.ne.s32.totalorder %s640_s30, %s432_s7  ;;  %p434_p3 = pneg %p646_p0 }
  0x18   : > { %s437_s16 = scalar_lea.hbm %s764_s1, 2048  ;;  %p438_p4 = scmp.lt.u32.totalorder %s640_s30, %s764_s1 }
  0x19   : > { %p435_p5 = pnand %p434_p3, %p433_p2  ;;  %p439_p7 = scmp.lt.u32.totalorder %s437_s16, %s432_s7 }
  0x1a   : > { %p441_p13 = scmp.lt.u32.totalorder %s432_s7, %s640_s30 }
  0x1b   : > { %p436_p6 = pneg %p435_p5  ;;  %p440_p10 = por %p439_p7, %p438_p4 }
  0x1d   : > { %p442_p12 = por %p441_p13, %p440_p10 }
  0x1f   : > { %p443_p1 = pnand %p442_p12, %p436_p6 }
  0x21   : > { %446 = shalt.err (!%p443_p1)
}
  0x22   : > { %s447_s20 = scalar_lea.vmem %s642_s4, 1024  ;;  %s546_s25 = smov [#allocation2]  }
  0x23   : > { %p448_p2 = scmp.ne.s32.totalorder %s642_s4, %s447_s20  ;;  %s452_s26 = sshll.u32 %s546_s25, 4  ;;  %s453_s26 = int_to_ptr.vmem [resolvable:$false] %s452_s26 }
  0x24   : > { %s454_s27 = scalar_lea.vmem %s453_s26, 2048  ;;  %p455_p9 = scmp.lt.s32.totalorder %s642_s4, %s453_s26 }
  0x25   : > { %p450_p5 = pnand %p448_p2, %p434_p3  ;;  %p456_p4 = scmp.lt.s32.totalorder %s454_s27, %s447_s20 }
  0x27   : > { %p451_p11 = pneg %p450_p5  ;;  %p457_p7 = por %p456_p4, %p455_p9 }
  0x29   : > { %p458_p10 = pnand %p457_p7, %p451_p11 }
  0x2b   : > { %461 = shalt.err (!%p458_p10)
}
  0x2c   : > { %s547_s28 = smov 128   ;;  %s548_s29 = smov 8  }
  0x2d   : > { %363 = dma.hbm_to_vmem [thread:$0]  (!%p646_p0), %s640_s30, 1024, %s642_s4, %s651_s6, %s547_s28, %s547_s28, %s548_s29  }
  0x2e   : > { %p148_p12 = scmp.lt.s32.totalorder %s544_s14, 3  ;;  %p772_p1 = scmp.ge.s32.totalorder %s544_s14, 1 }
  0x30   : > { %p149_p3 = pnand %p772_p1, %p148_p12 }
  0x31   : > { %s683_s3 = sand.u32 (!%p149_p3), 1, %s528_s10  }
  0x32   : > { %152 = sbr.rel (%p149_p3) target bundleno = 221 (0xdd), region = 28  ;;  %s347_s7 = sshll.u32 (!%p149_p3), %s683_s3, 6 }
  0x33   : > { %s155_s8 = scalar_lea.sflag (!%p149_p3), [#allocation3], %s683_s3  ;;  %s687_s15 = scalar_lea.vmem (!%p149_p3), [#allocation2], %s347_s7 }
  0x39   : > { %515 = dma.done.wait (%p618_p8), %s155_s8, 1024  }
  0x3a   : > { %517 = vsyncadd (%p618_p8), %s155_s8, 4294966272  ;;  %v549_v0 = vmov 1   ;;  %v550_v1 = vmov 0   ;;  %v179_v2 = vld [vmem:[%s763_s0] sm:$0xff]  ;;  %v180_v3 = vld [vmem:[%s763_s0 + $0x8] sm:$0xff]  ;;  %v551_v4 = vmov 2  }
  0x3b   : > { %427 = vset.pattern.permute.xlu1 %v549_v0  ;;  %426 = vset.pattern.permute.xlu0 %v550_v1  ;;  %v552_v5 = vmov 3   ;;  %v195_v10 = vld [vmem:[%s687_s15 + $0x10] sm:$0xff]  ;;  %v181_v11 = vld [vmem:[%s687_s15] sm:$0xff]  ;;  %v196_v12 = vld [vmem:[%s687_s15 + $0x18] sm:$0xff]  ;;  %s348_s21 = sshll.u32 %s683_s3, 4  ;;  %s355_s19 = sshll.u32 %s536_s12, 8 }
  0x3c   : > { %198 = vperm.xlu1 %427, %v179_v2   ;;  %185 = vperm.xlu0 %426, %v179_v2   ;;  %v182_v13 = vld [vmem:[%s687_s15 + $0x8] sm:$0xff]  ;;  %v209_v15 = vld [vmem:[%s687_s15 + $0x20] sm:$0xff]  ;;  %v223_v24 = vld [vmem:[%s687_s15 + $0x30] sm:$0xff]  ;;  %s178_s16 = scalar_lea.vmem [#allocation5], %s348_s21  ;;  %s714_s26 = scalar_lea.hbm %s765_s2, %s355_s19 }
  0x3d   : > { %v210_v14 = vld [vmem:[%s687_s15 + $0x28] sm:$0xff]  ;;  %s254_s18 = sshll.u32 %s178_s16, 4  ;;  %v224_v25 = vld [vmem:[%s687_s15 + $0x38] sm:$0xff]  ;;  %s240_s12 = scalar_lea.sflag [#allocation4], %s683_s3  ;;  %s709_s18 = int_to_ptr.vmem [resolvable:$true] %s254_s18 }
  0x3e   : > { %s462_s27 = scalar_lea.vmem %s709_s18, 256  ;;  %p773_p9 = scmp.ne.s32.totalorder %s769_s22, 0 }
  0x3f   : > { %p463_p8 = scmp.ne.s32.totalorder %s709_s18, %s462_s27  ;;  %s553_s28 = smov [#allocation5]  }
  0x40   : > { %202 = vperm.xlu1 %427, %v180_v3   ;;  %190 = vperm.xlu0 %426, %v180_v3   ;;  %s466_s29 = sshll.u32 %s553_s28, 4  ;;  %s467_s29 = int_to_ptr.vmem [resolvable:$false] %s466_s29 }
  0x41   : > { %p464_p11 = pnand %p463_p8, %p773_p9  ;;  %s468_s7 = scalar_lea.vmem %s467_s29, 512 }
  0x42   : > { %p469_p6 = scmp.lt.s32.totalorder %s709_s18, %s467_s29  ;;  %p470_p13 = scmp.lt.s32.totalorder %s468_s7, %s462_s27 }
  0x43   : > { %p465_p0 = pneg %p464_p11 }
  0x44   : > { %429 = vset.pattern.permute.xlu1 %v551_v4  ;;  %428 = vset.pattern.permute.xlu0 %v551_v4  ;;  %p471_p2 = por %p470_p13, %p469_p6 }
  0x45   : > { %216 = vperm.xlu1 %429, %v180_v3   ;;  %212 = vperm.xlu0 %428, %v179_v2  }
  0x46   : > { %p472_p5 = pnand %p471_p2, %p465_p0 }
  0x49   : > { %430 = vset.pattern.permute.xlu1 %v552_v5  ;;  %431 = vset.pattern.permute.xlu0 %v552_v5 }
  0x4a   : > { %226 = vperm.xlu1 %430, %v179_v2   ;;  %230 = vperm.xlu0 %431, %v180_v3  }
  0xbb   : > { %v199_v6 = vpop.permute.xlu1 %198  ;;  %v186_v7 = vpop.permute.xlu0 %185 }
  0xbc   : > { %v205_v16 = vmul.f32 %v199_v6, %v195_v10  ;;  %v193_v17 = vmul.f32 %v186_v7, %v181_v11 }
  0xbe   : > { %v207_v26 = vadd.f32 %v205_v16, %v193_v17 }
  0xbf   : > { %v203_v8 = vpop.permute.xlu1 %202  ;;  %v191_v9 = vpop.permute.xlu0 %190 }
  0xc0   : > { %v206_v18 = vmul.f32 %v203_v8, %v196_v12  ;;  %v194_v19 = vmul.f32 %v191_v9, %v182_v13 }
  0xc2   : > { %v208_v27 = vadd.f32 %v206_v18, %v194_v19 }
  0xc4   : > { %v217_v20 = vpop.permute.xlu1 %216  ;;  %v213_v21 = vpop.permute.xlu0 %212 }
  0xc5   : > { %v220_v22 = vmul.f32 %v217_v20, %v210_v14  ;;  %v219_v23 = vmul.f32 %v213_v21, %v209_v15 }
  0xc7   : > { %v222_v30 = vadd.f32 %v220_v22, %v208_v27  ;;  %v221_v31 = vadd.f32 %v219_v23, %v207_v26 }
  0xc9   : > { %v227_v28 = vpop.permute.xlu1 %226  ;;  %v231_v29 = vpop.permute.xlu0 %230 }
  0xca   : > { %v233_v32 = vmul.f32 %v227_v28, %v223_v24  ;;  %v234_v33 = vmul.f32 %v231_v29, %v224_v25 }
  0xcc   : > { %v235_v34 = vadd.f32 %v233_v32, %v221_v31  ;;  %v236_v35 = vadd.f32 %v234_v33, %v222_v30 }
  0xce   : > { %237 = vst [vmem:[%s178_s16] sm:$0xff] %v235_v34  ;;  %238 = vst [vmem:[%s178_s16 + $0x8] sm:$0xff] %v236_v35 }
  0xcf   : > { %475 = shalt.err (!%p472_p5)
}
  0xd0   : > { %s476_s8 = scalar_lea.hbm %s714_s26, 256  ;;  %s480_s4 = scalar_lea.hbm %s765_s2, 512 }
  0xd1   : > { %p477_p4 = scmp.ne.s32.totalorder %s714_s26, %s476_s8  ;;  %p481_p12 = scmp.lt.u32.totalorder %s714_s26, %s765_s2 }
  0xd2   : > { %p482_p1 = scmp.lt.u32.totalorder %s480_s4, %s476_s8  ;;  %p484_p8 = scmp.lt.u32.totalorder %s476_s8, %s714_s26 }
  0xd3   : > { %p478_p7 = pnand %p477_p4, %p773_p9 }
  0xd4   : > { %p483_p3 = por %p482_p1, %p481_p12 }
  0xd5   : > { %p479_p10 = pneg %p478_p7 }
  0xd6   : > { %p485_p11 = por %p484_p8, %p483_p3 }
  0xd8   : > { %p486_p0 = pnand %p485_p11, %p479_p10 }
  0xda   : > { %489 = shalt.err (!%p486_p0)
}
  0xdb   : > { %s554_s21 = smov 128   ;;  %s555_s16 = smov 8  }
  0xdc   : > { %358 = dma.vmem_to_hbm [thread:$0]  (%p773_p9), %s709_s18, 256, %s714_s26, %s240_s12, %s554_s21, %s554_s21, %s555_s16  }
  0xdd PF: > { %s269_s19 = sand.u32 1, %s524_s9   ;;  %p774_p6 = scmp.ne.s32.totalorder %s770_s24, 0 }
  0xde   : > { %p775_p13 = scmp.ge.s32.totalorder %s544_s14, 2  ;;  %s270_s20 = scalar_lea.sflag [#allocation4], %s269_s19 }
  0xe0   : > { %p365_p2 = pnand %p775_p13, %p774_p6 }
  0xe2   : > { %519 = dma.done.wait (!%p365_p2), %s270_s20, 256  }
  0xe3   : > { %521 = vsyncadd (!%p365_p2), %s270_s20, 4294967040  ;;  %s18_s14 = sadd.s32 1, %s544_s14   ;;  %s776_s9 = smov %s528_s10 }
  0xe4   : > { %p15_p5 = scmp.ge.s32.totalorder %s18_s14, 4   ;;  %s777_s10 = smov %s532_s11 }
  0xe5   : > { %s778_s11 = smov %s627_s23  ;;  %s779_s12 = smov %s540_s13 }
  0xe6   : > { %s780_s13 = smov %s782_s17  ;;  %17 = sbr.rel (!%p15_p5) target bundleno = 6 (0x6), region = 73 }
  0xed   :  { %275 = vsyncpa [#allocation3], 1 }
  0xee   :  { %277 = vsyncpa [#allocation3 + $0x1], 1 }
  0xef   :  { %278 = vsyncpa [#allocation4], 1 }
  0xf0   :  { %280 = vsyncpa [#allocation4 + $0x1], 1 }

</bundles_post_ra>
